<compile_context>
chip_gen: v7x
topology: tpu7x:2x2x1
jax: 0.10.0
libtpu: 0.0.40
codegen_flags: <defaults>
</compile_context>

<pallas_src>
import functools
import math

import jax
import jax.numpy as jnp
from jax.experimental import pallas as pl
from jax.experimental.pallas import tpu as pltpu

NEG_INF = -1e20  # ParlAI neginf() for float32


# ----------------------------- fused kernel ---------------------------------
def _poly_fused_kernel(codes_ref, ctxt_ref, cmask_ref, cand_ref, *rest,
                       mxu_dtype, codes_scale, cand_scale, use_rep_mask,
                       approx_recip):
    """One grid step = one batch tile.

    codes_ref:  (Nc, D)        shared learned codes (same block every step)
    ctxt_ref:   (BT, S, D)     context encoder output (keys AND values)
    cmask_ref:  (BT, 1, S)     context token mask (1 = real token)
    cand_ref:   (BT, C, D)     candidate embeddings
    [rmask_ref: (BT, 1, Nc)]   optional ctxt_rep mask (omitted for 'codes')
    rep_ref:    (BT, Nc, D)    out: ctxt_rep (encode() output)
    scores_ref: (BT, 1, C)     out: scores   (score() output)
    """
    if use_rep_mask:
        rmask_ref, rep_ref, scores_ref = rest
    else:
        rep_ref, scores_ref = rest
        rmask_ref = None

    bt = ctxt_ref.shape[0]

    ctxt = ctxt_ref[...]                                      # (BT, S, D) native dtype
    k_mxu = ctxt.astype(mxu_dtype)
    codes = codes_ref[...].astype(mxu_dtype)                  # (Nc, D)
    cmask = cmask_ref[...]                                    # (BT, 1, S)

    # ---- encode(): codes attention (keys == values == ctxt_out) ------------
    q1 = jnp.broadcast_to(codes[None], (bt,) + codes.shape)   # tiny, hoisted once/step
    l1 = jnp.einsum("bnd,bsd->bns", q1, k_mxu,
                    preferred_element_type=jnp.float32)        # (BT, Nc, S) f32
    if codes_scale != 1.0:
        l1 = l1 * codes_scale
    l1 = jnp.where(cmask != 0.0, l1, NEG_INF)                  # masked_fill(mask==0)
    l1 = l1 - jnp.max(l1, axis=-1, keepdims=True)
    e1 = jnp.exp(l1)
    d1 = jnp.sum(e1, axis=-1, keepdims=True)
    # Exact divide by default (matches torch F.softmax); EUP approx is opt-in.
    p1 = e1 * pl.reciprocal(d1, approx=True) if approx_recip else e1 / d1
    ctxt_rep = jnp.einsum("bns,bsd->bnd", p1.astype(mxu_dtype), k_mxu,
                          preferred_element_type=jnp.float32)  # (BT, Nc, D) f32
    rep_ref[...] = ctxt_rep.astype(rep_ref.dtype)

    # ---- score(): candidate attention over ctxt_rep + dot-product scores ---
    # scores[b,c] = sum_n p2[b,c,n] * (cand[b,c] . ctxt_rep[b,n])  (exact identity
    # with sum((p2 @ ctxt_rep) * cand, -1); skips the second (C,N)x(N,D) matmul).
    cand = cand_ref[...].astype(mxu_dtype)                     # (BT, C, D)
    s_raw = jnp.einsum("bcd,bnd->bcn", cand, ctxt_rep.astype(mxu_dtype),
                       preferred_element_type=jnp.float32)     # (BT, C, Nc) f32
    l2 = s_raw * cand_scale if cand_scale != 1.0 else s_raw
    if use_rep_mask:
        l2 = jnp.where(rmask_ref[...] != 0.0, l2, NEG_INF)
    l2 = l2 - jnp.max(l2, axis=-1, keepdims=True)
    e2 = jnp.exp(l2)
    d2 = jnp.sum(e2, axis=-1, keepdims=True)
    p2 = e2 * pl.reciprocal(d2, approx=True) if approx_recip else e2 / d2
    scores = jnp.sum(p2 * s_raw, axis=-1)                      # (BT, C)
    scores_ref[...] = scores[:, None, :].astype(scores_ref.dtype)


# ----------------------------- wrapper ---------------------------------------
def _attn_scale(attn_type, dim):
    if attn_type == "basic":
        return 1.0
    if attn_type == "sqrt":
        return 1.0 / math.sqrt(dim)
    raise NotImplementedError(f"attention type {attn_type!r} not supported")


def _default_batch_tile(bsz):
    # >= 2 grid steps so the 'parallel' axis can split across v7x's two
    # TensorCores and BlockSpec double-buffering overlaps DMA with compute;
    # >= 4 steps when the batch allows.  Per-step overhead is only ~0.35 us.
    if bsz <= 1:
        return max(bsz, 1)
    target_steps = 4 if bsz >= 4 else 2
    bt = max(1, bsz // target_steps)
    while bsz % bt:
        bt -= 1
    return bt


def poly_encode_and_score(codes, ctxt_out, ctxt_mask, cand_embed,
                          ctxt_rep_mask=None, *,
                          batch_tile=None,
                          mxu_dtype=None,
                          codes_attn="basic",
                          cand_attn="basic",
                          approx_softmax_recip=False,
                          vmem_limit_bytes=64 * 1024 * 1024,
                          ctxt_buffering=None):
    """Fused encode() + score() for PolyEncoderModule (polyencoder_type='codes').

    codes:         (n_codes, D)   learned codes parameter
    ctxt_out:      (B, S, D)      context encoder output (native dtype, e.g. bf16)
    ctxt_mask:     (B, S)         context token mask (nonzero = real token)
    cand_embed:    (B, C, D)      candidate encoder output
    ctxt_rep_mask: (B, n_codes) or None.  None (the 'codes' case, statically
                   all-ones) skips the mask DMA and the masking pass entirely.

    Returns (ctxt_rep (B, n_codes, D) in ctxt_out.dtype, scores (B, C) f32).
    """
    bsz, seq, dim = ctxt_out.shape
    n_codes = codes.shape[0]
    num_cands = cand_embed.shape[1]

    if batch_tile is None:
        # For production shapes pick batch_tile per-generation: blocks ~1+ MiB,
        # 2x-buffered total well under the scoped VMEM limit (<=~48 MiB on v7x).
        batch_tile = _default_batch_tile(bsz)
    assert bsz % batch_tile == 0, "batch_tile must divide the batch size"
    grid = (bsz // batch_tile,)

    if mxu_dtype is None:
        # bf16 inputs -> bf16 MXU operands (f32 accumulation via
        # preferred_element_type); f32 inputs -> f32 (reference parity).
        mxu_dtype = ctxt_out.dtype

    codes_scale = _attn_scale(codes_attn, dim)
    cand_scale = _attn_scale(cand_attn, dim)
    use_rep_mask = ctxt_rep_mask is not None

    # Masks are tiny; ship them as f32 (avoids bool-layout corner cases).
    cmask3 = ctxt_mask.astype(jnp.float32).reshape(bsz, 1, seq)

    kernel = functools.partial(
        _poly_fused_kernel,
        mxu_dtype=mxu_dtype,
        codes_scale=codes_scale,
        cand_scale=cand_scale,
        use_rep_mask=use_rep_mask,
        approx_recip=approx_softmax_recip,
    )

    # ctxt_out is the dominant DMA; optionally deepen its pipeline on v5e/v6e.
    ctxt_spec_kwargs = {}
    if ctxt_buffering is not None:
        ctxt_spec_kwargs["pipeline_mode"] = pl.Buffered(ctxt_buffering)

    in_specs = [
        # codes: same block every step -> stays VMEM-resident (no Bx copy in HBM).
        pl.BlockSpec((n_codes, dim), lambda b: (0, 0)),
        # ctxt_out passed ONCE (keys == values share one input ref).
        pl.BlockSpec((batch_tile, seq, dim), lambda b: (b, 0, 0),
                     **ctxt_spec_kwargs),
        pl.BlockSpec((batch_tile, 1, seq), lambda b: (b, 0, 0)),
        pl.BlockSpec((batch_tile, num_cands, dim), lambda b: (b, 0, 0)),
    ]
    inputs = [codes, ctxt_out, cmask3, cand_embed]
    if use_rep_mask:
        in_specs.append(pl.BlockSpec((batch_tile, 1, n_codes), lambda b: (b, 0, 0)))
        inputs.append(ctxt_rep_mask.astype(jnp.float32).reshape(bsz, 1, n_codes))

    out_specs = (
        pl.BlockSpec((batch_tile, n_codes, dim), lambda b: (b, 0, 0)),
        # (B, 1, C) slab: last two block dims equal the full array dims, so the
        # store is always legal; pad C to a multiple of 128 upstream for a fully
        # lane-dense unmasked vst.
        pl.BlockSpec((batch_tile, 1, num_cands), lambda b: (b, 0, 0)),
    )

    ctxt_rep, scores3 = pl.pallas_call(
        kernel,
        out_shape=(
            jax.ShapeDtypeStruct((bsz, n_codes, dim), ctxt_out.dtype),
            jax.ShapeDtypeStruct((bsz, 1, num_cands), jnp.float32),
        ),
        grid_spec=pltpu.PrefetchScalarGridSpec(
            num_scalar_prefetch=0,
            grid=grid,
            in_specs=in_specs,
            out_specs=out_specs,
        ),
        compiler_params=pltpu.CompilerParams(
            dimension_semantics=("parallel",),
            vmem_limit_bytes=vmem_limit_bytes,
        ),
    )(*inputs)

    return ctxt_rep, scores3.reshape(bsz, num_cands)


# ----------------------------- references (pure JAX, for checking) -----------
def _ref_basic_attention(q, k, v, mask):
    l1 = jnp.einsum("bqd,bkd->bqk", q, k, precision=jax.lax.Precision.HIGHEST)
    l1 = jnp.where(mask[:, None, :] != 0, l1, NEG_INF)
    p = jax.nn.softmax(l1, axis=-1)
    return jnp.einsum("bqk,bkd->bqd", p, v, precision=jax.lax.Precision.HIGHEST)


def _ref_score(ctxt_rep, ctxt_rep_mask, cand_embed):
    attended = _ref_basic_attention(cand_embed, ctxt_rep, ctxt_rep, ctxt_rep_mask)
    return jnp.sum(attended * cand_embed, axis=2)


# ----------------------------- main -------------------------------------------
if __name__ == "__main__":
    # Small shapes implied by the module's forward:
    bsz, seq_len, num_cands = 2, 8, 8
    embed_dim = 32          # opt['embedding_size']
    n_codes = 4             # opt['poly_n_codes'], polyencoder_type='codes'

    key = jax.random.PRNGKey(0)
    k_codes, k_ctxt, k_cand = jax.random.split(key, 3)

    # codes parameter: torch.nn.init.uniform_(empty(n_codes, embed_dim)) -> U[0,1)
    codes = jax.random.uniform(k_codes, (n_codes, embed_dim), dtype=jnp.float32)

    # Synthetic encoder outputs (TransformerEncoder not ported — see TODO above).
    ctxt_out = jax.random.normal(k_ctxt, (bsz, seq_len, embed_dim), dtype=jnp.float32)
    cand_embed = jax.random.normal(k_cand, (bsz, num_cands, embed_dim), dtype=jnp.float32)
    # token mask: 1 for real tokens, pad out the tail of batch element 1
    ctxt_mask = jnp.ones((bsz, seq_len), dtype=jnp.float32).at[1, 6:].set(0.0)

    # ---- fused encode() + score() in a single pallas_call ----
    # 'codes' poly-type -> ctxt_rep_mask is statically all-ones -> pass None so
    # the kernel skips that DMA and masking pass entirely.
    ctxt_rep, scores = poly_encode_and_score(codes, ctxt_out, ctxt_mask, cand_embed)
    ctxt_rep = jax.block_until_ready(ctxt_rep)
    scores = jax.block_until_ready(scores)

    # Numerical check against a pure-JAX reference of the PyTorch semantics.
    ctxt_rep_mask = jnp.ones((bsz, n_codes), dtype=jnp.float32)  # all-ones ('codes')
    codes_b = jnp.broadcast_to(codes[None], (bsz, n_codes, embed_dim))
    ctxt_rep_ref = _ref_basic_attention(codes_b, ctxt_out, ctxt_out, ctxt_mask)
    scores_ref = _ref_score(ctxt_rep_ref, ctxt_rep_mask, cand_embed)

    assert ctxt_rep.shape == (bsz, n_codes, embed_dim)
    assert scores.shape == (bsz, num_cands)
    assert jnp.allclose(ctxt_rep, ctxt_rep_ref, atol=2e-3, rtol=2e-3), (
        jnp.max(jnp.abs(ctxt_rep - ctxt_rep_ref)))
    assert jnp.allclose(scores, scores_ref, atol=2e-3, rtol=2e-3), (
        jnp.max(jnp.abs(scores - scores_ref)))

    print("KERNEL_OK")
</pallas_src>

<mosaic_0001>
module attributes {stable_mosaic.version = 11 : i64} {
  func.func @_poly_fused_kernel(%arg0: i32, %arg1: memref<4x32xf32, #tpu.memory_space<vmem>>, %arg2: memref<1x8x32xf32, #tpu.memory_space<vmem>>, %arg3: memref<1x1x8xf32, #tpu.memory_space<vmem>>, %arg4: memref<1x8x32xf32, #tpu.memory_space<vmem>>, %arg5: memref<1x4x32xf32, #tpu.memory_space<vmem>>, %arg6: memref<1x1x8xf32, #tpu.memory_space<vmem>>) attributes {dimension_semantics = [#tpu.dimension_semantics<parallel>], iteration_bounds = array<i64: 2>, scalar_prefetch = 0 : i64, scratch_operands = 0 : i64, tpu.core_type = #tpu.core_type<tc>, window_params = [{pipeline_mode = #tpu.pipeline_mode<synchronous>, transform_indices = @transform_0, window_bounds = array<i64: 4, 32>}, {transform_indices = @transform_1, window_bounds = array<i64: 1, 8, 32>}, {transform_indices = @transform_2, window_bounds = array<i64: 1, 1, 8>}, {transform_indices = @transform_3, window_bounds = array<i64: 1, 8, 32>}, {transform_indices = @transform_4, window_bounds = array<i64: 1, 4, 32>}, {transform_indices = @transform_5, window_bounds = array<i64: 1, 1, 8>}]} {
    %c0 = arith.constant 0 : index
    %c0_0 = arith.constant 0 : index
    %c0_1 = arith.constant 0 : index
    %0 = vector.load %arg2[%c0, %c0_0, %c0_1] : memref<1x8x32xf32, #tpu.memory_space<vmem>>, vector<1x8x32xf32>
    %c0_2 = arith.constant 0 : index
    %c0_3 = arith.constant 0 : index
    %1 = vector.load %arg1[%c0_2, %c0_3] : memref<4x32xf32, #tpu.memory_space<vmem>>, vector<4x32xf32>
    %c0_4 = arith.constant 0 : index
    %c0_5 = arith.constant 0 : index
    %c0_6 = arith.constant 0 : index
    %2 = vector.load %arg3[%c0_4, %c0_5, %c0_6] : memref<1x1x8xf32, #tpu.memory_space<vmem>>, vector<1x1x8xf32>
    %3 = vector.shape_cast %1 : vector<4x32xf32> to vector<1x4x32xf32>
    "tpu.trace_start"() <{level = 10 : i32, message = "bnd,bsd->bns"}> : () -> ()
    %cst = arith.constant dense<0.000000e+00> : vector<1x4x8xf32>
    %4 = tpu.matmul %3, %0, %cst {dimension_numbers = #tpu.dot_dimension_numbers<[2], [2], [1], [1], [0, 0, 0, 1, 1, 1], [0], [0]>} : vector<1x4x32xf32>, vector<1x8x32xf32>, vector<1x4x8xf32> -> vector<1x4x8xf32>
    %cst_7 = arith.constant 0.000000e+00 : f32
    "tpu.trace_stop"() : () -> ()
    %5 = vector.broadcast %cst_7 : f32 to vector<1x1x8xf32>
    %6 = arith.cmpf one, %2, %5 : vector<1x1x8xf32>
    %cst_8 = arith.constant -1.000000e+20 : f32
    %7 = vector.shape_cast %6 : vector<1x1x8xi1> to vector<1x1x8xi1>
    %8 = vector.broadcast %7 : vector<1x1x8xi1> to vector<1x4x8xi1>
    %9 = vector.broadcast %cst_8 : f32 to vector<1x4x8xf32>
    %10 = arith.select %8, %4, %9 : vector<1x4x8xi1>, vector<1x4x8xf32>
    %cst_9 = arith.constant dense<0xFF800000> : vector<1x4xf32>
    %11 = vector.multi_reduction <maximumf>, %10, %cst_9 [2] : vector<1x4x8xf32> to vector<1x4xf32>
    %12 = vector.shape_cast %11 : vector<1x4xf32> to vector<1x4x1xf32>
    %13 = vector.broadcast %12 : vector<1x4x1xf32> to vector<1x4x8xf32>
    %14 = arith.subf %10, %13 : vector<1x4x8xf32>
    %15 = math.exp %14 : vector<1x4x8xf32>
    %cst_10 = arith.constant dense<0.000000e+00> : vector<1x4xf32>
    %16 = vector.multi_reduction <add>, %15, %cst_10 [2] : vector<1x4x8xf32> to vector<1x4xf32>
    %17 = vector.shape_cast %16 : vector<1x4xf32> to vector<1x4x1xf32>
    %18 = vector.broadcast %17 : vector<1x4x1xf32> to vector<1x4x8xf32>
    %19 = arith.divf %15, %18 : vector<1x4x8xf32>
    "tpu.trace_start"() <{level = 10 : i32, message = "bns,bsd->bnd"}> : () -> ()
    %cst_11 = arith.constant dense<0.000000e+00> : vector<1x4x32xf32>
    %20 = tpu.matmul %19, %0, %cst_11 {dimension_numbers = #tpu.dot_dimension_numbers<[2], [1], [1], [2], [0, 0, 0, 1, 1, 2], [0], [0]>} : vector<1x4x8xf32>, vector<1x8x32xf32>, vector<1x4x32xf32> -> vector<1x4x32xf32>
    "tpu.trace_stop"() : () -> ()
    %c0_12 = arith.constant 0 : index
    %c0_13 = arith.constant 0 : index
    %c0_14 = arith.constant 0 : index
    %21 = vector.load %arg5[%c0_12, %c0_13, %c0_14] : memref<1x4x32xf32, #tpu.memory_space<vmem>>, vector<1x4x32xf32>
    tpu.vector_store %arg5[%c0_12, %c0_13, %c0_14], %20 {strides = array<i32>} : memref<1x4x32xf32, #tpu.memory_space<vmem>>, vector<1x4x32xf32>,
    %c0_15 = arith.constant 0 : index
    %c0_16 = arith.constant 0 : index
    %c0_17 = arith.constant 0 : index
    %22 = vector.load %arg4[%c0_15, %c0_16, %c0_17] : memref<1x8x32xf32, #tpu.memory_space<vmem>>, vector<1x8x32xf32>
    "tpu.trace_start"() <{level = 10 : i32, message = "bcd,bnd->bcn"}> : () -> ()
    %cst_18 = arith.constant dense<0.000000e+00> : vector<1x8x4xf32>
    %23 = tpu.matmul %22, %20, %cst_18 {dimension_numbers = #tpu.dot_dimension_numbers<[2], [2], [1], [1], [0, 0, 0, 1, 1, 1], [0], [0]>} : vector<1x8x32xf32>, vector<1x4x32xf32>, vector<1x8x4xf32> -> vector<1x8x4xf32>
    "tpu.trace_stop"() : () -> ()
    %cst_19 = arith.constant dense<0xFF800000> : vector<1x8xf32>
    %24 = vector.multi_reduction <maximumf>, %23, %cst_19 [2] : vector<1x8x4xf32> to vector<1x8xf32>
    %25 = vector.shape_cast %24 : vector<1x8xf32> to vector<1x8x1xf32>
    %26 = vector.broadcast %25 : vector<1x8x1xf32> to vector<1x8x4xf32>
    %27 = arith.subf %23, %26 : vector<1x8x4xf32>
    %28 = math.exp %27 : vector<1x8x4xf32>
    %cst_20 = arith.constant dense<0.000000e+00> : vector<1x8xf32>
    %29 = vector.multi_reduction <add>, %28, %cst_20 [2] : vector<1x8x4xf32> to vector<1x8xf32>
    %30 = vector.shape_cast %29 : vector<1x8xf32> to vector<1x8x1xf32>
    %31 = vector.broadcast %30 : vector<1x8x1xf32> to vector<1x8x4xf32>
    %32 = arith.divf %28, %31 : vector<1x8x4xf32>
    %33 = arith.mulf %32, %23 : vector<1x8x4xf32>
    %cst_21 = arith.constant dense<0.000000e+00> : vector<1x8xf32>
    %34 = vector.multi_reduction <add>, %33, %cst_21 [2] : vector<1x8x4xf32> to vector<1x8xf32>
    %35 = vector.shape_cast %34 : vector<1x8xf32> to vector<1x1x8xf32>
    %c0_22 = arith.constant 0 : index
    %c0_23 = arith.constant 0 : index
    %c0_24 = arith.constant 0 : index
    %36 = vector.load %arg6[%c0_22, %c0_23, %c0_24] : memref<1x1x8xf32, #tpu.memory_space<vmem>>, vector<1x1x8xf32>
    tpu.vector_store %arg6[%c0_22, %c0_23, %c0_24], %35 {strides = array<i32>} : memref<1x1x8xf32, #tpu.memory_space<vmem>>, vector<1x1x8xf32>,
    return
  }
  func.func @transform_0(%arg0: i32) -> (i32, i32) {
    %c0_i32 = arith.constant 0 : i32
    %c0_i32_0 = arith.constant 0 : i32
    %c0_i32_1 = arith.constant 0 : i32
    return %c0_i32, %c0_i32_0 : i32, i32
  }
  func.func @transform_1(%arg0: i32) -> (i32, i32, i32) {
    %c0_i32 = arith.constant 0 : i32
    %c0_i32_0 = arith.constant 0 : i32
    %c0_i32_1 = arith.constant 0 : i32
    return %arg0, %c0_i32, %c0_i32_0 : i32, i32, i32
  }
  func.func @transform_2(%arg0: i32) -> (i32, i32, i32) {
    %c0_i32 = arith.constant 0 : i32
    %c0_i32_0 = arith.constant 0 : i32
    %c0_i32_1 = arith.constant 0 : i32
    return %arg0, %c0_i32, %c0_i32_0 : i32, i32, i32
  }
  func.func @transform_3(%arg0: i32) -> (i32, i32, i32) {
    %c0_i32 = arith.constant 0 : i32
    %c0_i32_0 = arith.constant 0 : i32
    %c0_i32_1 = arith.constant 0 : i32
    return %arg0, %c0_i32, %c0_i32_0 : i32, i32, i32
  }
  func.func @transform_4(%arg0: i32) -> (i32, i32, i32) {
    %c0_i32 = arith.constant 0 : i32
    %c0_i32_0 = arith.constant 0 : i32
    %c0_i32_1 = arith.constant 0 : i32
    return %arg0, %c0_i32, %c0_i32_0 : i32, i32, i32
  }
  func.func @transform_5(%arg0: i32) -> (i32, i32, i32) {
    %c0_i32 = arith.constant 0 : i32
    %c0_i32_0 = arith.constant 0 : i32
    %c0_i32_1 = arith.constant 0 : i32
    return %arg0, %c0_i32, %c0_i32_0 : i32, i32, i32
  }
}

</mosaic_0001>

<bundles_post_ra>
// kernel: tpu_custom_call.1
= control target key start
LH: loop header
LB: loop body
LE: loop exit
PB: predicated region body
PF: predicated region fallthrough
CT: control target
= control target key end

     0   :  { %s1500_s0 = inlined_call_operand.hbm [shape: f32[4,32], index: 0, kind: input, shape index: {}]   ;;  %s1501_s1 = inlined_call_operand.hbm [shape: f32[2,8,32], index: 1, kind: input, shape index: {}]   ;;  %s1502_s2 = inlined_call_operand.hbm [shape: f32[2,1,8], index: 2, kind: input, shape index: {}]   ;;  %s1503_s3 = inlined_call_operand.hbm [shape: f32[2,8,32], index: 3, kind: input, shape index: {}]   ;;  %s1504_s4 = inlined_call_operand.hbm [shape: f32[2,4,32], index: 4, kind: output, shape index: {0}]   ;;  %s1505_s5 = inlined_call_operand.hbm [shape: f32[2,1,8], index: 5, kind: output, shape index: {1}]  }
   0x1   :  { %1519 = sst [smem:[#allocation20_spill]] %s1501_s1 }
   0x2   :  { %11 = vsyncpa [#allocation3], 0 }
   0x3   :  { %12 = vsyncpa [#allocation6], 0 }
   0x4   :  { %14 = vsyncpa [#allocation6 + $0x1], 0 }
   0x5   :  { %15 = vsyncpa [#allocation9], 0 }
   0x6   :  { %17 = vsyncpa [#allocation9 + $0x1], 0 }
   0x7   :  { %18 = vsyncpa [#allocation4], 0 }
   0x8   :  { %20 = vsyncpa [#allocation4 + $0x1], 0 }
   0x9   :  { %21 = vsyncpa [#allocation12], 0 }
   0xa   :  { %23 = vsyncpa [#allocation12 + $0x1], 0  ;;  %s1184_s18 = smov 0   ;;  %s1186_s19 = smov 0  }
   0xb   :  { %s1188_s20 = smov 0   ;;  %s1190_s21 = smov 0  }
   0xc LB: > { %1520 = sst [smem:[#allocation18_spill]] %s1139_s20  ;;  %s1205_s22 = sadd.s32 1, %s1143_s21   ;;  %s1143_s21 = sphi %s1190_s21, %s1548_s21   ;;  %s1139_s20 = sphi %s1188_s20, %s1545_s20   ;;  %s1135_s19 = sphi %s1186_s19, %s1547_s19   ;;  %s1131_s18 = sphi %s1184_s18, %s1546_s18  }
   0xd   : > { %s57_s23 = sadd.s32 1, %s1139_s20  ;;  %s54_s24 = ssub.s32 %s1143_s21, %s1205_s22 }
   0xe   : > { %p1506_p0 = scmp.ne.s32.totalorder %s1139_s20, %s1135_s19  ;;  %p55_p1 = scmp.eq.s32.totalorder %s54_s24, 0 }
   0xf   : > { %p65_p2 = scmp.eq.s32.totalorder %s1143_s21, 0  ;;  %p872_p4 = scmp.lt.s32.totalorder %s1143_s21, 2 }
  0x10   : > { %s1216_s25 = scalar_select %p55_p1, %s1139_s20, %s57_s23  }
  0x11   : > { %p66_p5 = por %p65_p2, %p1506_p0  ;;  %s209_s26 = sand.u32 1, %s1143_s21  }
  0x12   : > { %1521 = sst [smem:[#allocation19_spill]] %s1216_s25  ;;  %s1223_s27 = sand.u32 1, %s1139_s20  }
  0x13   : > { %s1507_s28 = sshll.u32 %s1223_s27, 3  ;;  %s1508_s29 = sshll.u32 %s1143_s21, 7 }
  0x14   : > { %s1522_s1 = sld [smem:[#allocation20_spill]]  ;;  %s213_s8 = scalar_lea.vmem [#allocation5], %s1507_s28 }
  0x15   : > { %s220_s9 = sshll.u32 %s213_s8, 4  ;;  %p1236_p6 = pnand %p872_p4, %p66_p5  ;;  %s1240_s9 = int_to_ptr.vmem [resolvable:$true] %s220_s9 }
  0x16   : > { %s1242_s11 = scalar_lea.sflag [#allocation6], %s209_s26 }
  0x17   : > { %s1523_s10 = scalar_select %p1236_p6, 1, 0 }
  0x18   : > { %p1248_p8 = pneg %p1236_p6 }
  0x1a   : > { %s1232_s7 = scalar_lea.hbm %s1522_s1, %s1508_s29  ;;  %s924_s16 = scalar_lea.hbm %s1522_s1, 256 }
  0x1b   : > { %s919_s12 = scalar_lea.hbm %s1232_s7, 128  ;;  %p925_p11 = scmp.lt.u32.totalorder %s1232_s7, %s1522_s1 }
  0x1c   : > { %p920_p7 = scmp.ne.s32.totalorder %s1232_s7, %s919_s12  ;;  %p926_p12 = scmp.lt.u32.totalorder %s924_s16, %s919_s12 }
  0x1d   : > { %s1524_s13 = scalar_select %p1248_p8, 1, 0 }
  0x1e   : > { %p922_p9 = pnand %p1248_p8, %p920_p7  ;;  %p927_p13 = por %p926_p12, %p925_p11 }
  0x1f   : > { %p928_p1 = scmp.lt.u32.totalorder %s919_s12, %s1232_s7 }
  0x20   : > { %p923_p10 = pneg %p922_p9 }
  0x21   : > { %p929_p2 = por %p928_p1, %p927_p13 }
  0x23   : > { %p930_p4 = pnand %p929_p2, %p923_p10 }
  0x25   : > { %933 = shalt.err (!%p930_p4)
}
  0x26   : > { %s934_s24 = scalar_lea.vmem %s1240_s9, 128  ;;  %s1145_s26 = smov [#allocation5]  }
  0x27   : > { %p935_p5 = scmp.ne.s32.totalorder %s1240_s9, %s934_s24  ;;  %s939_s30 = sshll.u32 %s1145_s26, 4  ;;  %s940_s30 = int_to_ptr.vmem [resolvable:$false] %s939_s30 }
  0x28   : > { %s941_s6 = scalar_lea.vmem %s940_s30, 256  ;;  %p942_p3 = scmp.lt.s32.totalorder %s1240_s9, %s940_s30 }
  0x29   : > { %p937_p7 = pnand %p935_p5, %p1248_p8  ;;  %p943_p0 = scmp.lt.s32.totalorder %s941_s6, %s934_s24 }
  0x2b   : > { %p938_p9 = pneg %p937_p7  ;;  %p944_p11 = por %p943_p0, %p942_p3 }
  0x2d   : > { %p945_p12 = pnand %p944_p11, %p938_p9 }
  0x2f   : > { %948 = shalt.err (!%p945_p12)
}
  0x30   : > { %857 = dma.hbm_to_vmem [thread:$0]  (!%p1236_p6), %s1232_s7, 128, %s1240_s9, %s1242_s11  }
  0x31   : > { %s1273_s8 = sadd.s32 4294967295, %s1143_s21   ;;  %s791_s12 = sadd.s32 4294967294, %s1143_s21  }
  0x32   : > { %p70_p0 = scmp.ne.s32.totalorder %s1135_s19, %s1131_s18  ;;  %p1509_p3 = scmp.eq.s32.totalorder %s1273_s8, 0 }
  0x33   : > { %p146_p10 = scmp.eq.s32.totalorder %s1273_s8, 1  ;;  %p152_p13 = scmp.eq.s32.totalorder %s791_s12, 1 }
  0x34   : > { %p1282_p1 = por %p1509_p3, %p70_p0  ;;  %p792_p2 = scmp.ge.s32.totalorder %s1143_s21, 1 }
  0x35   : > { %p1526_p4 = scmp.ne.s32.totalorder %s1139_s20, %s1135_s19  ;;  %p1294_p7 = por %p152_p13, %p70_p0 }
  0x36   : > { %s1525_s14 = scalar_select %p1282_p1, 1, 0 }
  0x37   : > { %p1290_p5 = por %p146_p10, %p1526_p4  ;;  %p185_p9 = scmp.lt.s32.totalorder %s1143_s21, 3 }
  0x38   : > { %s1528_s9 = scalar_select %p1294_p7, 1, 0 }
  0x39   : > { %s1527_s7 = scalar_select %p1290_p5, 1, 0 }
  0x3a   : > { %p1299_p11 = pnand %p792_p2, %p185_p9  ;;  %s1146_s16 = smov [#allocation2]  }
  0x3b   : > { %s198_s17 = sshll.u32 %s1146_s16, 4  ;;  %s797_s23 = sshll.u32 %s1143_s21, 4  ;;  %s1303_s17 = int_to_ptr.vmem [resolvable:$true] %s198_s17 }
  0x3c   : > { %s1529_s15 = scalar_select %p1299_p11, 1, 0 }
  0x3d   : > { %p850_p12 = pneg %p1299_p11  ;;  %s1311_s30 = scalar_lea.hbm %s1502_s2, %s797_s23 }
  0x3e   : > { %s230_s6 = scalar_lea.vmem [#allocation7], %s1223_s27  ;;  %s949_s16 = scalar_lea.hbm %s1311_s30, 16 }
  0x3f   : > { %s237_s12 = sshll.u32 %s230_s6, 4  ;;  %p1316_p0 = pnand %p850_p12, %p1509_p3  ;;  %s238_s12 = int_to_ptr.vmem [resolvable:$true] %s237_s12 }
  0x40   : > { %p950_p10 = scmp.ne.s32.totalorder %s1311_s30, %s949_s16  ;;  %s954_s26 = scalar_lea.hbm %s1502_s2, 32 }
  0x41   : > { %s1530_s28 = scalar_select %p1316_p0, 1, 0 }
  0x42   : > { %p952_p13 = pnand %p950_p10, %p1248_p8  ;;  %p955_p4 = scmp.lt.u32.totalorder %s1311_s30, %s1502_s2 }
  0x43   : > { %p956_p9 = scmp.lt.u32.totalorder %s954_s26, %s949_s16  ;;  %p958_p12 = scmp.lt.u32.totalorder %s949_s16, %s1311_s30 }
  0x44   : > { %p953_p2 = pneg %p952_p13 }
  0x45   : > { %p957_p7 = por %p956_p9, %p955_p4 }
  0x47   : > { %p959_p3 = por %p958_p12, %p957_p7 }
  0x49   : > { %p960_p5 = pnand %p959_p3, %p953_p2 }
  0x4b   : > { %963 = shalt.err (!%p960_p5)
}
  0x4c   : > { %s964_s6 = scalar_lea.vmem %s238_s12, 16  ;;  %s1147_s25 = smov [#allocation7]  }
  0x4d   : > { %p965_p1 = scmp.ne.s32.totalorder %s238_s12, %s964_s6  ;;  %s969_s20 = sshll.u32 %s1147_s25, 4  ;;  %s970_s20 = int_to_ptr.vmem [resolvable:$false] %s969_s20 }
  0x4e   : > { %s971_s24 = scalar_lea.vmem %s970_s20, 32  ;;  %p972_p11 = scmp.lt.s32.totalorder %s238_s12, %s970_s20 }
  0x4f   : > { %p967_p10 = pnand %p965_p1, %p1248_p8  ;;  %p973_p0 = scmp.lt.s32.totalorder %s971_s24, %s964_s6 }
  0x51   : > { %p968_p13 = pneg %p967_p10  ;;  %p974_p6 = por %p973_p0, %p972_p11 }
  0x53   : > { %p975_p4 = pnand %p974_p6, %p968_p13 }
  0x55   : > { %978 = shalt.err (!%p975_p4)
}
  0x56   : > { %p1531_p9 = scmp.ne.s32.totalorder %s1523_s10, 0  ;;  %s979_s16 = scalar_lea.hbm %s1500_s0, 64 }
  0x57   : > { %p980_p3 = scmp.ne.s32.totalorder %s1500_s0, %s979_s16  ;;  %p1532_p1 = scmp.ne.s32.totalorder %s1530_s28, 0 }
  0x58   : > { %860 = dma.hbm_to_vmem [thread:$0]  (!%p1531_p9), %s1311_s30, 16, %s238_s12, %s1242_s11  }
  0x59   : > { %p981_p5 = pneg %p1532_p1  ;;  %p986_p6 = scmp.lt.u32.totalorder %s979_s16, %s1500_s0 }
  0x5b   : > { %p982_p7 = pnand %p981_p5, %p980_p3 }
  0x5d   : > { %p983_p11 = pneg %p982_p7 }
  0x5f   : > { %p988_p0 = pnand %p986_p6, %p983_p11 }
  0x61   : > { %991 = shalt.err (!%p988_p0)
}
  0x62   : > { %s992_s11 = scalar_lea.vmem %s1303_s17, 64  ;;  %p1000_p13 = scmp.lt.s32.totalorder %s1303_s17, %s1303_s17 }
  0x63   : > { %p993_p2 = scmp.ne.s32.totalorder %s1303_s17, %s992_s11  ;;  %p1001_p4 = scmp.lt.s32.totalorder %s992_s11, %s992_s11 }
  0x65   : > { %p995_p12 = pnand %p993_p2, %p981_p5  ;;  %p1002_p9 = por %p1001_p4, %p1000_p13 }
  0x67   : > { %p996_p10 = pneg %p995_p12 }
  0x69   : > { %p1003_p8 = pnand %p1002_p9, %p996_p10 }
  0x6b   : > { %1006 = shalt.err (!%p1003_p8)
}
  0x6c   : > { %853 = dma.hbm_to_vmem [thread:$0]  (!%p1532_p1), %s1500_s0, 64, %s1303_s17, [#allocation3]  }
  0x6d   : > { %s1533_s6 = sshll.u32 %s1143_s21, 7  ;;  %s1534_s16 = sshll.u32 %s1223_s27, 3 }
  0x6e   : > { %s1364_s29 = scalar_lea.hbm %s1503_s3, %s1533_s6  ;;  %s248_s28 = scalar_lea.vmem [#allocation8], %s1534_s16 }
  0x6f   : > { %s255_s23 = sshll.u32 %s248_s28, 4  ;;  %s245_s26 = scalar_lea.sflag [#allocation9], %s1223_s27  ;;  %s256_s23 = int_to_ptr.vmem [resolvable:$true] %s255_s23 }
  0x70   : > { %s1007_s20 = scalar_lea.hbm %s1364_s29, 128  ;;  %p1535_p9 = scmp.ne.s32.totalorder %s1524_s13, 0 }
  0x71   : > { %p1008_p8 = scmp.ne.s32.totalorder %s1364_s29, %s1007_s20  ;;  %s1012_s11 = scalar_lea.hbm %s1503_s3, 256 }
  0x72   : > { %p1013_p5 = scmp.lt.u32.totalorder %s1364_s29, %s1503_s3  ;;  %p1014_p7 = scmp.lt.u32.totalorder %s1012_s11, %s1007_s20 }
  0x73   : > { %p1010_p3 = pnand %p1008_p8, %p1535_p9  ;;  %p1016_p6 = scmp.lt.u32.totalorder %s1007_s20, %s1364_s29 }
  0x74   : > { %p1015_p11 = por %p1014_p7, %p1013_p5 }
  0x75   : > { %p1011_p1 = pneg %p1010_p3 }
  0x76   : > { %p1017_p0 = por %p1016_p6, %p1015_p11 }
  0x78   : > { %p1018_p2 = pnand %p1017_p0, %p1011_p1 }
  0x7a   : > { %1021 = shalt.err (!%p1018_p2)
}
  0x7b   : > { %s1022_s27 = scalar_lea.vmem %s256_s23, 128  ;;  %s1148_s6 = smov [#allocation8]  }
  0x7c   : > { %p1023_p12 = scmp.ne.s32.totalorder %s256_s23, %s1022_s27  ;;  %s1027_s24 = sshll.u32 %s1148_s6, 4  ;;  %s1028_s24 = int_to_ptr.vmem [resolvable:$false] %s1027_s24 }
  0x7d   : > { %s1029_s1 = scalar_lea.vmem %s1028_s24, 256  ;;  %p1030_p4 = scmp.lt.s32.totalorder %s256_s23, %s1028_s24 }
  0x7e   : > { %p1025_p10 = pnand %p1023_p12, %p1535_p9  ;;  %p1031_p8 = scmp.lt.s32.totalorder %s1029_s1, %s1022_s27 }
  0x80   : > { %p1026_p13 = pneg %p1025_p10  ;;  %p1032_p3 = por %p1031_p8, %p1030_p4 }
  0x82   : > { %p1033_p5 = pnand %p1032_p3, %p1026_p13 }
  0x84   : > { %1036 = shalt.err (!%p1033_p5)
}
  0x85   : > { %p1536_p7 = scmp.ne.s32.totalorder %s1523_s10, 0  ;;  %p1537_p1 = scmp.ne.s32.totalorder %s1529_s15, 0 }
  0x86   : > { %p1538_p11 = scmp.eq.s32.totalorder (!%p1537_p1), %s1273_s8, 0 }
  0x87   : > { %863 = dma.hbm_to_vmem [thread:$0]  (!%p1536_p7), %s1364_s29, 128, %s256_s23, %s245_s26  }
  0x88   : > { %264 = sbr.rel (%p1537_p1) target bundleno = 1587 (0x633), region = 36 }
  0x8f   : > { %1110 = dma.done.wait (%p1538_p11), [#allocation3], 64   ;;  %p1539_p9 = pmov %p1538_p11 }
  0x90   : > { %s270_s13 = sand.u32 1, %s1273_s8   ;;  %s1394_s16 = sand.u32 1, %s1135_s19  }
  0x91   : > { %1112 = vsyncadd (%p1539_p9), [#allocation3], 4294967232  ;;  %s802_s28 = sshll.u32 %s1394_s16, 3  ;;  %s271_s10 = scalar_lea.sflag [#allocation6], %s270_s13 }
  0x92   : > { %s274_s20 = scalar_lea.vmem [#allocation5], %s802_s28  ;;  %p1540_p6 = scmp.ne.s32.totalorder %s1525_s14, 0 }
  0x94   : > { %1114 = dma.done.wait (%p1540_p6), %s271_s10, 144  }
  0x95   : > { %1116 = vsyncadd (%p1540_p6), %s271_s10, 4294967152  ;;  %s282_s15 = scalar_lea.vmem [#allocation7], %s1394_s16  ;;  %s288_s29 = scalar_lea.sflag [#allocation9], %s1394_s16 }
  0x96   : > { %s1403_s23 = scalar_lea.vmem [#allocation8], %s802_s28 }
  0x97   : > { %1118 = dma.done.wait (%p1540_p6), %s288_s29, 128  }
  0x98   : > { %1120 = vsyncadd (%p1540_p6), %s288_s29, 4294967168  ;;  %v1149_v0 = vmov 0.0   ;;  %vm1150_vm0 = vmmov 0   ;;  %vm334_vm1 = vcmask 261120   ;;  %v331_v1 = vld [vmem:[%s274_s20] sm:$0xff]  ;;  %v413_v3 = vlaneseq  ;;  %s804_s14 = sshll.u32 %s1394_s16, 2 }
  0x99   : > { %821 = vmatprep.subr.mxu0 %v1149_v0  ;;  %823 = vmatprep.mubr.msk.f32.mxu0 %vm1150_vm0, %v1149_v0  ;;  %v332_v2 = vld [vmem:[#allocation2] sm:$0xf]  ;;  %v1151_v7 = vmov 0   ;;  %vm419_vm4 = vcmask 60416   ;;  %vm431_vm5 = vcmask 64512   ;;  %vm505_vm6 = vcmask 257024  }
  0x9a   : > { %826 = vmatprep.subr.mxu1 %v1149_v0  ;;  %828 = vmatprep.mubr.msk.f32.mxu1 %vm1150_vm0, %v1149_v0  ;;  %v333_v4 = vld [vmem:[%s282_s15] sm:$0x1]  ;;  %v1414_v5 = vshrl.u32 %v413_v3, 7  ;;  %s324_s26 = scalar_lea.vmem [#allocation10], %s804_s14  ;;  %vm584_vm7 = vcmask 31744   ;;  %s811_s17 = sshll.u32 %s1273_s8, 6 }
  0x9b   : > { %822 = vmatpush3.xpose.msk.msra.mxu0 %vm334_vm1, %v331_v1  ;;  %827 = vmatpush3.msra.mxu1 %v331_v1  ;;  %vm411_vm2 = vcmp.ne.f32.partialorder %v333_v4, 0.0  ;;  %v507_v24 = vld [vmem:[%s1403_s23] sm:$0xff]  ;;  %s1429_s30 = scalar_lea.hbm %s1504_s4, %s811_s17  ;;  %s628_s12 = sshll.u32 %s324_s26, 4  ;;  %s629_s12 = int_to_ptr.vmem [resolvable:$true] %s628_s12 }
  0x9c   : > { %831 = vmatprep.subr.mxu1 %v1149_v0  ;;  %v415_v6 = vsub.s32 0, %v1414_v5  ;;  %v412_v8 = vsel %vm411_vm2, 1, %v1151_v7  ;;  %s611_s27 = scalar_lea.sflag [#allocation4], %s1394_s16  ;;  %s1037_s6 = scalar_lea.vmem %s629_s12, 64 }
  0x9d   : > { %p1038_p0 = scmp.ne.s32.totalorder %s629_s12, %s1037_s6  ;;  %p1541_p2 = scmp.ne.s32.totalorder %s1527_s7, 0 }
  0x9e   : > { %824 = vmatmul.mubr.msk.f32.vlgmr.msra.gmra.mrb[0].mxu0 %vm334_vm1, %v332_v2  ;;  %v416_v9 = vrot.slane %v412_v8, %v415_v6  ;;  %s1152_s24 = smov [#allocation10]  }
  0x9f   : > { %p1039_p12 = pnand %p1038_p0, %p1541_p2  ;;  %s1041_s1 = sshll.u32 %s1152_s24, 4  ;;  %s1042_s1 = int_to_ptr.vmem [resolvable:$false] %s1041_s1 }
  0xa0   : > { %vm417_vm3 = vcmp.eq.s32.totalorder %v416_v9, 1  ;;  %s1043_s13 = scalar_lea.vmem %s1042_s1, 128  ;;  %p1044_p13 = scmp.lt.s32.totalorder %s629_s12, %s1042_s1 }
  0xa1   : > { %p1040_p10 = pneg %p1039_p12  ;;  %p1045_p4 = scmp.lt.s32.totalorder %s1043_s13, %s1037_s6 }
  0xa3   : > { %p1046_p8 = por %p1045_p4, %p1044_p13 }
  0xa5   : > { %p1047_p3 = pnand %p1046_p8, %p1040_p10 }
 0x171   : > { %v407_v10 = vpop.f32.mrb[0].mxu0 }
 0x172   : > { %v418_v11 = vsel %vm417_vm3, %v407_v10, -1e+20  ;;  %v825_v12 = vpop.f32.mrb[1].mxu0 }
 0x173   : > { %v420_v13 = vsel %vm419_vm4, %v418_v11, -inf }
 0x174   : > { %421 = vmax.xlane.f32.xlu0 %v420_v13 }
 0x201   : > { %v422_v14 = vpop.xlane.xlu0 %421 }
 0x202   : > { %v423_v15 = vsub.f32 %v418_v11, %v422_v14 }
 0x204   : > { %v424_v16 = vmul.f32 1.442695, %v423_v15 }
 0x206   : > { %911 = vpow2.f32 %v424_v16 }
 0x210   : > { %v912_v17 = vpop.eup %911 }
 0x211   : > { %v426_v18 = vsel %vm419_vm4, %v912_v17, 0.0 }
 0x212   : > { %427 = vadd.xlane.f32.xlu0 %v426_v18 }
 0x29f   : > { %v428_v19 = vpop.xlane.xlu0 %427 }
 0x2a0   : > { %913 = vrcp.f32 %v428_v19 }
 0x2aa   : > { %v914_v20 = vpop.eup %913 }
 0x2ab   : > { %v430_v21 = vmul.f32 %v914_v20, %v912_v17 }
 0x2ad   : > { %829 = vmatmul.mubr.msk.f32.vlgmr.msra.gmra.mrb[0].mxu1 %vm431_vm5, %v430_v21 }
 0x2ae   : > { %833 = vmatprep.mubr.msk.f32.mxu1 %vm1150_vm0, %v1149_v0 }
 0x380   : > { %v501_v22 = vpop.f32.mrb[0].mxu1 }
 0x381   : > { %506 = vst.msk [vmem:[%s324_s26] sm:$0xf] %vm505_vm6, %v501_v22  ;;  %v830_v23 = vpop.f32.mrb[1].mxu1  ;;  %832 = vmatpush3.xpose.msk.msra.mxu1 %vm334_vm1, %v501_v22 }
 0x384   : > { %834 = vmatmul.mubr.msk.f32.vlgmr.msra.gmra.mrb[2].mxu1 %vm334_vm1, %v507_v24 }
 0x457   : > { %v580_v25 = vpop.f32.mrb[2].mxu1 }
 0x458   : > { %v835_v26 = vpop.f32.mrb[3].mxu1  ;;  %v585_v27 = vsel %vm584_vm7, %v580_v25, -inf }
 0x459   : > { %586 = vmax.xlane.f32.xlu1 %v585_v27 }
 0x4e6   : > { %v587_v28 = vpop.xlane.xlu1 %586 }
 0x4e7   : > { %v588_v29 = vsub.f32 %v580_v25, %v587_v28 }
 0x4e9   : > { %v589_v30 = vmul.f32 1.442695, %v588_v29 }
 0x4eb   : > { %915 = vpow2.f32 %v589_v30 }
 0x4f5   : > { %v916_v31 = vpop.eup %915 }
 0x4f6   : > { %v591_v32 = vsel %vm584_vm7, %v916_v31, 0.0 }
 0x4f7   : > { %592 = vadd.xlane.f32.xlu1 %v591_v32 }
 0x584   : > { %v593_v33 = vpop.xlane.xlu1 %592 }
 0x585   : > { %917 = vrcp.f32 %v593_v33 }
 0x58f   : > { %v918_v34 = vpop.eup %917 }
 0x590   : > { %v595_v35 = vmul.f32 %v918_v34, %v916_v31 }
 0x592   : > { %v596_v36 = vmul.f32 %v595_v35, %v580_v25 }
 0x594   : > { %v597_v37 = vsel %vm584_vm7, %v596_v36, 0.0 }
 0x595   : > { %598 = vadd.xlane.f32.xlu0 %v597_v37 }
 0x596   : > { %1050 = shalt.err (!%p1047_p3)
}
 0x597   : > { %s1051_s28 = scalar_lea.hbm %s1429_s30, 64  ;;  %s1055_s15 = scalar_lea.hbm %s1504_s4, 128 }
 0x598   : > { %p1052_p5 = scmp.ne.s32.totalorder %s1429_s30, %s1051_s28  ;;  %p1056_p11 = scmp.lt.u32.totalorder %s1429_s30, %s1504_s4 }
 0x599   : > { %p1057_p9 = scmp.lt.u32.totalorder %s1055_s15, %s1051_s28  ;;  %p1059_p0 = scmp.lt.u32.totalorder %s1051_s28, %s1429_s30 }
 0x59a   : > { %p1053_p7 = pnand %p1052_p5, %p1541_p2 }
 0x59b   : > { %p1058_p6 = por %p1057_p9, %p1056_p11 }
 0x59c   : > { %p1054_p1 = pneg %p1053_p7 }
 0x59d   : > { %p1060_p12 = por %p1059_p0, %p1058_p6 }
 0x59f   : > { %p1061_p10 = pnand %p1060_p12, %p1054_p1 }
 0x5a1   : > { %1064 = shalt.err (!%p1061_p10)
}
 0x5a2   : > { %846 = dma.vmem_to_hbm [thread:$0]  (%p1541_p2), %s629_s12, 64, %s1429_s30, %s611_s27   ;;  %v602_v38 = vand.u32 127, %v413_v3  ;;  %vm608_vm8 = vcmask 57344  }
 0x5a3   : > { %s812_s14 = sshll.u32 %s1273_s8, 4  ;;  %s330_s26 = scalar_lea.vmem [#allocation11], %s1394_s16 }
 0x5a4   : > { %v605_v39 = vsub.s32 %v602_v38, %v1414_v5  ;;  %s641_s17 = sshll.u32 %s330_s26, 4  ;;  %s1456_s6 = scalar_lea.hbm %s1505_s5, %s812_s14  ;;  %s1458_s17 = int_to_ptr.vmem [resolvable:$true] %s641_s17 }
 0x5a5   : > { %s616_s30 = scalar_lea.sflag [#allocation12], %s1394_s16  ;;  %s1065_s12 = scalar_lea.vmem %s1458_s17, 16 }
 0x5a6   : > { %p1066_p13 = scmp.ne.s32.totalorder %s1458_s17, %s1065_s12  ;;  %s1153_s8 = smov [#allocation11]  }
 0x5a7   : > { %s1069_s27 = sshll.u32 %s1153_s8, 4  ;;  %s1070_s27 = int_to_ptr.vmem [resolvable:$false] %s1069_s27 }
 0x5a8   : > { %p1067_p4 = pnand %p1066_p13, %p1541_p2  ;;  %s1071_s24 = scalar_lea.vmem %s1070_s27, 32 }
 0x5a9   : > { %p1072_p3 = scmp.lt.s32.totalorder %s1458_s17, %s1070_s27  ;;  %p1073_p5 = scmp.lt.s32.totalorder %s1071_s24, %s1065_s12 }
 0x5aa   : > { %p1068_p8 = pneg %p1067_p4 }
 0x5ab   : > { %p1074_p7 = por %p1073_p5, %p1072_p3 }
 0x5ad   : > { %p1075_p1 = pnand %p1074_p7, %p1068_p8 }
 0x622   : > { %v599_v40 = vpop.xlane.xlu0 %598 }
 0x623   : > { %v606_v41 = vrot.slane %v599_v40, %v605_v39 }
 0x625   : > { %609 = vst.msk [vmem:[%s330_s26] sm:$0x1] %vm608_vm8, %v606_v41 }
 0x626   : > { %1078 = shalt.err (!%p1075_p1)
}
 0x627   : > { %s1079_s16 = scalar_lea.hbm %s1456_s6, 16  ;;  %s1083_s28 = scalar_lea.hbm %s1505_s5, 32 }
 0x628   : > { %p1080_p11 = scmp.ne.s32.totalorder %s1456_s6, %s1079_s16  ;;  %p1084_p0 = scmp.lt.u32.totalorder %s1456_s6, %s1505_s5 }
 0x629   : > { %p1085_p12 = scmp.lt.u32.totalorder %s1083_s28, %s1079_s16  ;;  %p1087_p13 = scmp.lt.u32.totalorder %s1079_s16, %s1456_s6 }
 0x62a   : > { %p1081_p9 = pnand %p1080_p11, %p1541_p2 }
 0x62b   : > { %p1086_p10 = por %p1085_p12, %p1084_p0 }
 0x62c   : > { %p1082_p6 = pneg %p1081_p9 }
 0x62d   : > { %p1088_p4 = por %p1087_p13, %p1086_p10 }
 0x62f   : > { %p1089_p8 = pnand %p1088_p4, %p1082_p6 }
 0x631   : > { %1092 = shalt.err (!%p1089_p8)
}
 0x632   : > { %847 = dma.vmem_to_hbm [thread:$0]  (%p1541_p2), %s1458_s17, 16, %s1456_s6, %s616_s30  }
 0x633 PF: > { %s653_s15 = sand.u32 1, %s1131_s18   ;;  %p1542_p3 = scmp.ne.s32.totalorder %s1528_s9, 0 }
 0x634   : > { %p1543_p5 = scmp.ge.s32.totalorder %s1143_s21, 2  ;;  %s654_s29 = scalar_lea.sflag [#allocation4], %s653_s15 }
 0x636   : > { %p865_p7 = pnand %p1543_p5, %p1542_p3 }
 0x638   : > { %1122 = dma.done.wait (!%p865_p7), %s654_s29, 64  }
 0x639   : > { %1124 = vsyncadd (!%p865_p7), %s654_s29, 4294967232  ;;  %s663_s23 = scalar_lea.sflag [#allocation12], %s653_s15 }
 0x63a   : > { %1126 = dma.done.wait (!%p865_p7), %s663_s23, 16  }
 0x63b   : > { %1128 = vsyncadd (!%p865_p7), %s663_s23, 4294967280  ;;  %s1544_s7 = sld [smem:[#allocation18_spill]]  ;;  %s1545_s20 = sld [smem:[#allocation19_spill]] }
 0x63c   : > { %p26_p2 = scmp.ge.s32.totalorder %s1205_s22, 4   ;;  %s1546_s18 = smov %s1135_s19 }
 0x63d   : > { %s1548_s21 = smov %s1205_s22 }
 0x63e   :  { %28 = sbr.rel (!%p26_p2) target bundleno = 12 (0xc), region = 127 }
 0x641   : > { %s1547_s19 = smov %s1544_s7 }
 0x645   :  { %667 = vsyncpa [#allocation3], 1 }
 0x646   :  { %669 = vsyncpa [#allocation3 + $0x1], 1 }
 0x647   :  { %670 = vsyncpa [#allocation6], 1 }
 0x648   :  { %672 = vsyncpa [#allocation6 + $0x1], 1 }
 0x649   :  { %673 = vsyncpa [#allocation9], 1 }
 0x64a   :  { %675 = vsyncpa [#allocation9 + $0x1], 1 }
 0x64b   :  { %676 = vsyncpa [#allocation4], 1 }
 0x64c   :  { %678 = vsyncpa [#allocation4 + $0x1], 1 }
 0x64d   :  { %679 = vsyncpa [#allocation12], 1 }
 0x64e   :  { %681 = vsyncpa [#allocation12 + $0x1], 1 }

</bundles_post_ra>
